<compile_context>
chip_gen: v6e
topology: v6e:2x2x1
jax: 0.10.0
libtpu: 0.0.40
codegen_flags: <defaults>
</compile_context>

<pallas_src>
import functools

import jax
import jax.numpy as jnp
from jax.experimental import pallas as pl
from jax.experimental.pallas import tpu as pltpu


def _round_up(x, m):
    return ((x + m - 1) // m) * m


def _lora_kernel(x_ref, a_ref, b_ref, o_ref, *, alpha):
    # First matmul on the MXU, f32 accumulation.
    xa = jnp.dot(x_ref[...], a_ref[...], preferred_element_type=jnp.float32)
    # Scale the small (tile_m, rank) intermediate (out_dim/rank fewer VPU muls
    # than scaling the wide output), then feed the second MXU matmul.
    xa = (alpha * xa).astype(b_ref.dtype)
    out = jnp.dot(xa, b_ref[...], preferred_element_type=jnp.float32)
    o_ref[...] = out.astype(o_ref.dtype)


def lora_forward(x, A, B, alpha, *, tile_m=512, compute_dtype=None,
                 vmem_budget_bytes=32 * 1024 * 1024):
    """x: (..., in_dim) -> (..., out_dim), computed as alpha * (x @ A @ B)."""
    in_dim, rank = A.shape
    rank_b, out_dim = B.shape
    assert rank == rank_b
    orig_shape = x.shape
    assert orig_shape[-1] == in_dim

    out_dtype = x.dtype
    cdt = jnp.dtype(compute_dtype) if compute_dtype is not None else jnp.dtype(x.dtype)

    x2d = x.reshape(-1, in_dim).astype(cdt)
    A_c = A.astype(cdt)
    B_c = B.astype(cdt)
    M = x2d.shape[0]

    # Lane-dense output: pad out_dim up to a multiple of 128 so output blocks
    # lower to unmasked stores; slice the padding off after the kernel.
    LANE = 128
    out_dim_p = _round_up(out_dim, LANE)
    if out_dim_p != out_dim:
        B_c = jnp.pad(B_c, ((0, 0), (0, out_dim_p - out_dim)))

    in_size = cdt.itemsize
    out_size = jnp.dtype(out_dtype).itemsize
    sub = max(8, 32 // in_size)  # sublane granularity: 8 rows f32, 16 rows bf16

    # Derive tile_m from the VMEM budget: the x tile and the out tile are each
    # double-buffered by the pipeline; A/B are small and resident.
    resident = 2 * (in_dim * rank + rank * out_dim_p) * in_size
    per_row = 2 * (in_dim * in_size + out_dim_p * out_size)
    avail = max(vmem_budget_bytes - resident, per_row * sub)
    tile_cap = max(sub, (avail // per_row) // sub * sub)
    tm = int(min(int(tile_m), int(tile_cap)))
    tm = max(sub, (tm // sub) * sub)
    tm = min(tm, _round_up(M, sub))  # never tile wider than (padded) M

    # Pad M to a multiple of the row tile (padding rows are zeros; sliced off).
    M_p = _round_up(M, tm)
    if M_p != M:
        x2d = jnp.pad(x2d, ((0, M_p - M), (0, 0)))

    kernel = functools.partial(_lora_kernel, alpha=float(alpha))

    cost = pl.CostEstimate(
        flops=2 * M * rank * (in_dim + out_dim),
        transcendentals=0,
        bytes_accessed=int(M * in_dim * in_size + M * out_dim_p * out_size
                           + (in_dim * rank + rank * out_dim_p) * in_size),
    )

    out2d = pl.pallas_call(
        kernel,
        out_shape=jax.ShapeDtypeStruct((M_p, out_dim_p), out_dtype),
        grid_spec=pltpu.PrefetchScalarGridSpec(
            num_scalar_prefetch=0,
            grid=(M_p // tm,),
            in_specs=[
                pl.BlockSpec((tm, in_dim), lambda i: (i, 0)),       # x row tile
                pl.BlockSpec((in_dim, rank), lambda i: (0, 0)),     # A (full, resident)
                pl.BlockSpec((rank, out_dim_p), lambda i: (0, 0)),  # B (full, resident)
            ],
            out_specs=pl.BlockSpec((tm, out_dim_p), lambda i: (i, 0)),
        ),
        compiler_params=pltpu.CompilerParams(
            dimension_semantics=("parallel",),   # shards grid across v7x's 2 TCs
            vmem_limit_bytes=48 * 1024 * 1024,   # within v7x 64 MiB, v5e/v6e 128 MiB
        ),
        cost_estimate=cost,
    )(x2d, A_c, B_c)

    out2d = out2d[:M, :out_dim]
    return out2d.reshape(*orig_shape[:-1], out_dim)


def init_lora_params(key, in_dim, out_dim, rank):
    # Mirrors the PyTorch __init__:
    #   A = randn(in_dim, rank) * 1/sqrt(rank)
    #   B = zeros(rank, out_dim)
    std_dev = 1.0 / jnp.sqrt(jnp.asarray(rank, jnp.float32))
    A = jax.random.normal(key, (in_dim, rank), dtype=jnp.float32) * std_dev
    B = jnp.zeros((rank, out_dim), dtype=jnp.float32)
    return A, B


if __name__ == "__main__":
    key = jax.random.PRNGKey(0)
    k_x, k_a, k_b = jax.random.split(key, 3)

    batch, seq, in_dim, out_dim, rank = 2, 8, 32, 32, 8
    alpha = 4.0

    x = jax.random.normal(k_x, (batch, seq, in_dim), dtype=jnp.float32)
    A, B = init_lora_params(k_a, in_dim, out_dim, rank)

    # 1) Exact module semantics (B is zeros at init -> output is zeros), f32 path.
    out = jax.block_until_ready(lora_forward(x, A, B, alpha))
    ref = alpha * (x @ A @ B)
    assert out.shape == (batch, seq, out_dim)
    assert jnp.allclose(out, ref, atol=1e-5, rtol=1e-5)

    # 2) Nonzero-B sanity path (f32 compute).
    B_nz = jax.random.normal(k_b, (rank, out_dim), jnp.float32) * 0.02
    out_nz = jax.block_until_ready(lora_forward(x, A, B_nz, alpha))
    ref_nz = alpha * (x @ A @ B_nz)
    assert jnp.allclose(out_nz, ref_nz, atol=1e-4, rtol=1e-4)

    # 3) bf16 MXU inputs with f32 accumulation (mem-bound fast path), looser tol.
    out_bf16 = jax.block_until_ready(
        lora_forward(x, A, B_nz, alpha, compute_dtype=jnp.bfloat16))
    assert out_bf16.dtype == x.dtype
    assert jnp.allclose(out_bf16, ref_nz, atol=5e-2, rtol=5e-2)

    print("KERNEL_OK")
</pallas_src>

<mosaic_0001>
module attributes {stable_mosaic.version = 11 : i64} {
  func.func @_lora_kernel(%arg0: i32, %arg1: memref<16x32xf32, #tpu.memory_space<vmem>>, %arg2: memref<32x8xf32, #tpu.memory_space<vmem>>, %arg3: memref<8x128xf32, #tpu.memory_space<vmem>>, %arg4: memref<16x128xf32, #tpu.memory_space<vmem>>) attributes {dimension_semantics = [#tpu.dimension_semantics<parallel>], iteration_bounds = array<i64: 1>, scalar_prefetch = 0 : i64, scratch_operands = 0 : i64, tpu.core_type = #tpu.core_type<tc>, window_params = [{transform_indices = @transform_0, window_bounds = array<i64: 16, 32>}, {pipeline_mode = #tpu.pipeline_mode<synchronous>, transform_indices = @transform_1, window_bounds = array<i64: 32, 8>}, {pipeline_mode = #tpu.pipeline_mode<synchronous>, transform_indices = @transform_2, window_bounds = array<i64: 8, 128>}, {transform_indices = @transform_3, window_bounds = array<i64: 16, 128>}]} {
    %c0 = arith.constant 0 : index
    %c0_0 = arith.constant 0 : index
    %0 = vector.load %arg1[%c0, %c0_0] : memref<16x32xf32, #tpu.memory_space<vmem>>, vector<16x32xf32>
    %c0_1 = arith.constant 0 : index
    %c0_2 = arith.constant 0 : index
    %1 = vector.load %arg2[%c0_1, %c0_2] : memref<32x8xf32, #tpu.memory_space<vmem>>, vector<32x8xf32>
    %cst = arith.constant dense<0.000000e+00> : vector<16x8xf32>
    %2 = tpu.matmul %0, %1, %cst {dimension_numbers = #tpu.dot_dimension_numbers<[1], [0], [0], [1], [0, 0, 1, 1], [], []>} : vector<16x32xf32>, vector<32x8xf32>, vector<16x8xf32> -> vector<16x8xf32>
    %cst_3 = arith.constant 4.000000e+00 : f32
    %3 = vector.broadcast %cst_3 : f32 to vector<16x8xf32>
    %4 = arith.mulf %3, %2 : vector<16x8xf32>
    %c0_4 = arith.constant 0 : index
    %c0_5 = arith.constant 0 : index
    %5 = vector.load %arg3[%c0_4, %c0_5] : memref<8x128xf32, #tpu.memory_space<vmem>>, vector<8x128xf32>
    %cst_6 = arith.constant dense<0.000000e+00> : vector<16x128xf32>
    %6 = tpu.matmul %4, %5, %cst_6 {dimension_numbers = #tpu.dot_dimension_numbers<[1], [0], [0], [1], [0, 0, 1, 1], [], []>} : vector<16x8xf32>, vector<8x128xf32>, vector<16x128xf32> -> vector<16x128xf32>
    %c0_7 = arith.constant 0 : index
    %c0_8 = arith.constant 0 : index
    %7 = vector.load %arg4[%c0_7, %c0_8] : memref<16x128xf32, #tpu.memory_space<vmem>>, vector<16x128xf32>
    tpu.vector_store %arg4[%c0_7, %c0_8], %6 {strides = array<i32>} : memref<16x128xf32, #tpu.memory_space<vmem>>, vector<16x128xf32>,
    return
  }
  func.func @transform_0(%arg0: i32) -> (i32, i32) {
    %c0_i32 = arith.constant 0 : i32
    %c0_i32_0 = arith.constant 0 : i32
    return %arg0, %c0_i32 : i32, i32
  }
  func.func @transform_1(%arg0: i32) -> (i32, i32) {
    %c0_i32 = arith.constant 0 : i32
    %c0_i32_0 = arith.constant 0 : i32
    %c0_i32_1 = arith.constant 0 : i32
    return %c0_i32, %c0_i32_0 : i32, i32
  }
  func.func @transform_2(%arg0: i32) -> (i32, i32) {
    %c0_i32 = arith.constant 0 : i32
    %c0_i32_0 = arith.constant 0 : i32
    %c0_i32_1 = arith.constant 0 : i32
    return %c0_i32, %c0_i32_0 : i32, i32
  }
  func.func @transform_3(%arg0: i32) -> (i32, i32) {
    %c0_i32 = arith.constant 0 : i32
    %c0_i32_0 = arith.constant 0 : i32
    return %arg0, %c0_i32 : i32, i32
  }
}

</mosaic_0001>

<bundles_post_ra>
// kernel: tpu_custom_call.1
= control target key start
LH: loop header
LB: loop body
LE: loop exit
PB: predicated region body
PF: predicated region fallthrough
CT: control target
= control target key end

     0   :  { %vm21_vm0 = vcmask 261120   ;;  %s307_s0 = inlined_call_operand.vmem [shape: f32[16,32], index: 0, kind: input, shape index: {}]   ;;  %s308_s1 = inlined_call_operand.vmem [shape: f32[32,8], index: 1, kind: input, shape index: {}]   ;;  %s309_s2 = inlined_call_operand.vmem [shape: f32[8,128], index: 2, kind: input, shape index: {}]   ;;  %s310_s3 = inlined_call_operand.hbm [shape: f32[16,128], index: 3, kind: output, shape index: {}]  }
   0x1   :  { %v20_v0 = vld [vmem:[%s308_s1 + $0x18] sm:$0xff]  ;;  %v19_v1 = vld [vmem:[%s308_s1 + $0x10] sm:$0xff]  ;;  %v15_v2 = vld [vmem:[%s307_s0] sm:$0xff] }
   0x2   :  { %219 = vmatprep.subr.mxu0 %v20_v0  ;;  %v18_v3 = vld [vmem:[%s308_s1 + $0x8] sm:$0xff]  ;;  %227 = vmatprep.mubr.msk.f32.mxu0 %vm21_vm0, %v15_v2 }
   0x3   :  { %220 = vmatpush3.msra.mxu0 %v20_v0 }
   0x4   :  { %8 = vsyncpa [#allocation3], 0  ;;  %221 = vmatprep.subr.mxu0 %v19_v1  ;;  %v17_v4 = vld [vmem:[%s308_s1] sm:$0xff]  ;;  %v16_v5 = vld [vmem:[%s307_s0 + $0x8] sm:$0xff]  ;;  %vm106_vm1 = vcmask 64512   ;;  %s260_s1 = smov [#allocation2]  }
   0x5   :  { %222 = vmatpush3.msra.mxu0 %v19_v1  ;;  %v105_v6 = vld [vmem:[%s309_s2] sm:$0xff]  ;;  %s195_s26 = sshll.u32 %s260_s1, 4  ;;  %s196_s26 = int_to_ptr.vmem [resolvable:$true] %s195_s26 }
   0x6   :  { %223 = vmatprep.subr.mxu0 %v18_v3  ;;  %230 = vmatprep.subr.mxu1 %v105_v6  ;;  %s238_s0 = scalar_lea.vmem %s196_s26, 256  ;;  %p243_p1 = scmp.lt.s32.totalorder %s196_s26, %s196_s26 }
   0x7   :  { %224 = vmatpush3.msra.mxu0 %v18_v3  ;;  %231 = vmatpush3.msra.mxu1 %v105_v6  ;;  %p239_p0 = scmp.ne.s32.totalorder %s196_s26, %s238_s0  ;;  %p244_p2 = scmp.lt.s32.totalorder %s238_s0, %s238_s0 }
   0x8   :  { %225 = vmatprep.subr.mxu0 %v17_v4 }
   0x9   :  { %226 = vmatpush3.msra.mxu0 %v17_v4  ;;  %p245_p3 = por %p244_p2, %p243_p1 }
   0xa   :  { %228 = vmatmul.mubr.msk.f32.vlgmr.msra.gmra.mxu0 %vm21_vm0, %v16_v5 }
   0xb   :  { %p246_p4 = pnand %p245_p3, %p239_p0 }
  0xca   :  { %v229_v7 = vpop.f32.mrf.mxu0 }
  0xcb   :  { %v104_v10 = vmul.f32 4.0, %v229_v7 }
  0xcc   :  { %v94_v8 = vpop.f32.mrf.mxu0 }
  0xcd   :  { %v103_v9 = vmul.f32 4.0, %v94_v8 }
  0xcf   :  { %232 = vmatprep.mubr.msk.f32.mxu1 %vm106_vm1, %v103_v9 }
  0xd0   :  { %233 = vmatmul.mubr.msk.f32.vlgmr.msra.gmra.mxu1 %vm106_vm1, %v104_v10 }
 0x190   :  { %v234_v11 = vpop.f32.mrf.mxu1 }
 0x191   :  { %189 = vst [vmem:[#allocation2 + $0x8] sm:$0xff] %v234_v11 }
 0x192   :  { %v179_v12 = vpop.f32.mrf.mxu1 }
 0x193   :  { %188 = vst [vmem:[#allocation2] sm:$0xff] %v179_v12 }
 0x194   :  { %249 = shalt.err (!%p246_p4)
}
 0x195   :  { %s261_s2 = smov 128   ;;  %s262_s27 = smov 8  }
 0x196   :  { %201 = dma.vmem_to_hbm [thread:$0]  %s196_s26, 256, %s310_s3, [#allocation3], %s261_s2, %s261_s2, %s262_s27  }
 0x197   :  { %258 = dma.done.wait [#allocation3], 256  }
 0x198   :  { %259 = vsyncadd [#allocation3], 4294967040 }
 0x199   :  { %205 = vsyncpa [#allocation3], 1 }

</bundles_post_ra>
